<compile_context>
chip_gen: v7x
topology: tpu7x:2x2x1
jax: 0.10.0
libtpu: 0.0.40
codegen_flags: <defaults>
</compile_context>

<pallas_src>
import math
from functools import partial

import jax
import jax.numpy as jnp
from jax.experimental import pallas as pl
from jax.experimental.pallas import tpu as pltpu

NEG_SLOPE = 0.01   # nn.LeakyReLU default negative_slope
BN_EPS = 1e-5      # nn.BatchNorm1d default eps
LANE = 128         # TPU lane width


def _round_up(n, m):
    return ((n + m - 1) // m) * m


def _make_kernel(num_linear):
    """Kernel for `num_linear` Linear layers; LeakyReLU after all but the last."""

    def kernel(x_ref, *rest):
        o_ref = rest[-1]
        params = rest[:-1]
        h = x_ref[...].astype(jnp.float32)
        for li in range(num_linear):
            wt_ref, b_ref = params[2 * li], params[2 * li + 1]
            h = jnp.dot(h, wt_ref[...], preferred_element_type=jnp.float32) + b_ref[...]
            if li < num_linear - 1:
                # LeakyReLU (BN already folded into wt/b)
                h = jnp.maximum(h, NEG_SLOPE * h)
        # Dropout1d(p=0.01) before the final Linear is identity in eval mode.
        o_ref[...] = h.astype(o_ref.dtype)

    return kernel


def init_params(spec, key):
    """Deterministic parameters mirroring the torch module, with eval-mode
    BatchNorm folded into each hidden Linear.

    Returns flat list [Wt_0, b_0, Wt_1, b_1, ..., Wt_last, b_last] where
    Wt is (fan_in, fan_out) and b is (1, fan_out).
    """
    params = []
    num_hidden = len(spec) - 2
    keys = jax.random.split(key, 6 * (num_hidden + 1))
    k = 0
    for li in range(num_hidden):
        fan_in, fan_out = spec[li], spec[li + 1]
        bound = 1.0 / math.sqrt(fan_in)
        W = jax.random.uniform(keys[k], (fan_out, fan_in), jnp.float32, -bound, bound); k += 1
        b = jax.random.uniform(keys[k], (fan_out,), jnp.float32, -bound, bound); k += 1
        # BatchNorm1d params / running stats (eval mode), non-trivial values.
        gamma = 1.0 + 0.1 * jax.random.normal(keys[k], (fan_out,), jnp.float32); k += 1
        beta = 0.1 * jax.random.normal(keys[k], (fan_out,), jnp.float32); k += 1
        run_mean = 0.1 * jax.random.normal(keys[k], (fan_out,), jnp.float32); k += 1
        run_var = jax.random.uniform(keys[k], (fan_out,), jnp.float32, 0.5, 1.5); k += 1
        scale = gamma * jax.lax.rsqrt(run_var + BN_EPS)
        shift = beta - run_mean * scale
        # Fold BN into the Linear (exact for eval-mode BN).
        Wt_folded = W.T * scale[None, :]                    # (fan_in, fan_out)
        b_folded = b * scale + shift                        # (fan_out,)
        params += [Wt_folded, b_folded.reshape(1, fan_out)]
    fan_in, fan_out = spec[-2], spec[-1]
    bound = 1.0 / math.sqrt(fan_in)
    W = jax.random.uniform(keys[k], (fan_out, fan_in), jnp.float32, -bound, bound); k += 1
    b = jax.random.uniform(keys[k], (fan_out,), jnp.float32, -bound, bound); k += 1
    params += [W.T, b.reshape(1, fan_out)]
    return params


def _choose_tile_m(B, max_tile):
    """Large row tiles to amortize per-step overhead, but keep >=2 grid steps
    when possible so v7x's second TensorCore gets work."""
    tile = min(max_tile, _round_up(B, 8))
    if pl.cdiv(B, tile) < 2 and B > 8:
        tile = _round_up(pl.cdiv(B, 2), 8)
    return max(tile, 8)


def _pad2d(a, rows, cols):
    pr, pc = rows - a.shape[0], cols - a.shape[1]
    if pr or pc:
        a = jnp.pad(a, ((0, pr), (0, pc)))
    return a


@partial(jax.jit, static_argnames=("spec", "tile_m", "max_tile"))
def shallow_net_forward(signal, params, *, spec, tile_m=None, max_tile=1024):
    """Forward pass matching MyShallowNet.forward (eval mode)."""
    if signal.ndim == 2:
        x = signal
        restore = None
    elif signal.ndim == 3:
        n, m, d = signal.shape
        # The module reshapes the result back to (n, m, d) with the *input* d,
        # which is only valid if the output feature dim equals d.
        assert spec[-1] == d, "3-D path requires spec[-1] == input feature dim"
        x = signal.reshape(n * m, d)
        restore = (n, m, d)
    else:
        raise NotImplementedError("Please flatten your data appropriately")

    B, D0 = x.shape
    assert D0 == spec[0]
    num_linear = len(spec) - 1
    d_out = spec[-1]

    # ---- lane padding: every feature dim rounded up to a multiple of 128 ----
    pdims = [_round_up(d, LANE) for d in spec]
    padded_params = []
    for li in range(num_linear):
        Wt, b = params[2 * li], params[2 * li + 1]
        padded_params.append(_pad2d(Wt, pdims[li], pdims[li + 1]))
        padded_params.append(_pad2d(b, 1, pdims[li + 1]))

    # ---- row tiling (pad rows to a tile multiple instead of asserting) ----
    tm = tile_m if tile_m is not None else _choose_tile_m(B, max_tile)
    Bp = tm * pl.cdiv(B, tm)
    xp = x
    if Bp != B or pdims[0] != D0:
        xp = jnp.pad(x, ((0, Bp - B), (0, pdims[0] - D0)))

    # Input/output tiled over rows; every parameter is a single full block.
    in_specs = [pl.BlockSpec((tm, pdims[0]), lambda i: (i, 0))]
    for p in padded_params:
        # bind ndim now (avoid late-binding closure bug)
        in_specs.append(pl.BlockSpec(p.shape, lambda i, _nd=p.ndim: (0,) * _nd))

    flops = 2 * B * sum(a * b for a, b in zip(spec[:-1], spec[1:]))
    bytes_accessed = 4 * (B * D0 + B * d_out
                          + sum(spec[i] * spec[i + 1] + spec[i + 1]
                                for i in range(num_linear)))
    cost = pl.CostEstimate(flops=flops, transcendentals=0,
                           bytes_accessed=int(bytes_accessed))

    out = pl.pallas_call(
        _make_kernel(num_linear),
        out_shape=jax.ShapeDtypeStruct((Bp, pdims[-1]), jnp.float32),
        grid=(Bp // tm,),
        in_specs=in_specs,
        out_specs=pl.BlockSpec((tm, pdims[-1]), lambda i: (i, 0)),
        compiler_params=pltpu.CompilerParams(
            dimension_semantics=("parallel",)),
        cost_estimate=cost,
    )(xp, *padded_params)

    out = out[:B, :d_out]
    if restore is not None:
        n, m, d = restore
        out = out.reshape(n, m, d)
    return out


def _reference(signal, params, spec):
    """Pure-JAX reference (uses the same BN-folded params)."""
    if signal.ndim == 3:
        n, m, d = signal.shape
        x = signal.reshape(n * m, d)
    else:
        x = signal
    num_linear = len(spec) - 1
    h = x
    for li in range(num_linear):
        Wt, b = params[2 * li], params[2 * li + 1]
        h = h @ Wt + b
        if li < num_linear - 1:
            h = jnp.maximum(h, NEG_SLOPE * h)
    if signal.ndim == 3:
        h = h.reshape(signal.shape)
    return h


if __name__ == "__main__":
    # spec = [in_dim, hidden1, hidden2, out_dim]; spec[-1] == spec[0] so the
    # 3-D path's reshape back to (n, m, d) is valid, as the module assumes.
    spec = (32, 64, 64, 32)
    key = jax.random.PRNGKey(0)
    k_sig, k_par, k_sig2 = jax.random.split(key, 3)
    params = init_params(spec, k_par)

    # 3-D input (n, m, d) exercises the flatten/reshape branch of forward().
    signal = jax.random.normal(k_sig, (2, 8, 32), jnp.float32)
    out = jax.block_until_ready(shallow_net_forward(signal, params, spec=spec))
    ref = _reference(signal, params, spec)
    assert out.shape == signal.shape, (out.shape, signal.shape)
    assert jnp.allclose(out, ref, atol=1e-5, rtol=1e-5), "3-D mismatch vs reference"

    # 2-D input with a batch that is not a tile multiple exercises row padding.
    signal2 = jax.random.normal(k_sig2, (300, 32), jnp.float32)
    out2 = jax.block_until_ready(shallow_net_forward(signal2, params, spec=spec))
    ref2 = _reference(signal2, params, spec)
    assert out2.shape == (300, spec[-1]), out2.shape
    assert jnp.allclose(out2, ref2, atol=1e-5, rtol=1e-5), "2-D mismatch vs reference"

    print("KERNEL_OK")
</pallas_src>

<mosaic_0001>
module attributes {stable_mosaic.version = 11 : i64} {
  func.func @kernel(%arg0: i32, %arg1: memref<8x128xf32, #tpu.memory_space<vmem>>, %arg2: memref<128x128xf32, #tpu.memory_space<vmem>>, %arg3: memref<1x128xf32, #tpu.memory_space<vmem>>, %arg4: memref<128x128xf32, #tpu.memory_space<vmem>>, %arg5: memref<1x128xf32, #tpu.memory_space<vmem>>, %arg6: memref<128x128xf32, #tpu.memory_space<vmem>>, %arg7: memref<1x128xf32, #tpu.memory_space<vmem>>, %arg8: memref<8x128xf32, #tpu.memory_space<vmem>>) attributes {dimension_semantics = [#tpu.dimension_semantics<parallel>], iteration_bounds = array<i64: 2>, scalar_prefetch = 0 : i64, scratch_operands = 0 : i64, tpu.core_type = #tpu.core_type<tc>, window_params = [{transform_indices = @transform_0, window_bounds = array<i64: 8, 128>}, {pipeline_mode = #tpu.pipeline_mode<synchronous>, transform_indices = @transform_1, window_bounds = array<i64: 128, 128>}, {pipeline_mode = #tpu.pipeline_mode<synchronous>, transform_indices = @transform_2, window_bounds = array<i64: 1, 128>}, {pipeline_mode = #tpu.pipeline_mode<synchronous>, transform_indices = @transform_3, window_bounds = array<i64: 128, 128>}, {pipeline_mode = #tpu.pipeline_mode<synchronous>, transform_indices = @transform_4, window_bounds = array<i64: 1, 128>}, {pipeline_mode = #tpu.pipeline_mode<synchronous>, transform_indices = @transform_5, window_bounds = array<i64: 128, 128>}, {pipeline_mode = #tpu.pipeline_mode<synchronous>, transform_indices = @transform_6, window_bounds = array<i64: 1, 128>}, {transform_indices = @transform_7, window_bounds = array<i64: 8, 128>}]} {
    %c0 = arith.constant 0 : index
    %c0_0 = arith.constant 0 : index
    %0 = vector.load %arg1[%c0, %c0_0] : memref<8x128xf32, #tpu.memory_space<vmem>>, vector<8x128xf32>
    %c0_1 = arith.constant 0 : index
    %c0_2 = arith.constant 0 : index
    %1 = vector.load %arg2[%c0_1, %c0_2] : memref<128x128xf32, #tpu.memory_space<vmem>>, vector<128x128xf32>
    %cst = arith.constant dense<0.000000e+00> : vector<8x128xf32>
    %2 = tpu.matmul %0, %1, %cst {dimension_numbers = #tpu.dot_dimension_numbers<[1], [0], [0], [1], [0, 0, 1, 1], [], []>} : vector<8x128xf32>, vector<128x128xf32>, vector<8x128xf32> -> vector<8x128xf32>
    %c0_3 = arith.constant 0 : index
    %c0_4 = arith.constant 0 : index
    %3 = vector.load %arg3[%c0_3, %c0_4] : memref<1x128xf32, #tpu.memory_space<vmem>>, vector<1x128xf32>
    %4 = vector.broadcast %3 : vector<1x128xf32> to vector<8x128xf32>
    %5 = arith.addf %2, %4 : vector<8x128xf32>
    %cst_5 = arith.constant 0.00999999977 : f32
    %6 = vector.broadcast %cst_5 : f32 to vector<8x128xf32>
    %7 = arith.mulf %6, %5 : vector<8x128xf32>
    %8 = arith.maximumf %5, %7 : vector<8x128xf32>
    %c0_6 = arith.constant 0 : index
    %c0_7 = arith.constant 0 : index
    %9 = vector.load %arg4[%c0_6, %c0_7] : memref<128x128xf32, #tpu.memory_space<vmem>>, vector<128x128xf32>
    %cst_8 = arith.constant dense<0.000000e+00> : vector<8x128xf32>
    %10 = tpu.matmul %8, %9, %cst_8 {dimension_numbers = #tpu.dot_dimension_numbers<[1], [0], [0], [1], [0, 0, 1, 1], [], []>} : vector<8x128xf32>, vector<128x128xf32>, vector<8x128xf32> -> vector<8x128xf32>
    %c0_9 = arith.constant 0 : index
    %c0_10 = arith.constant 0 : index
    %11 = vector.load %arg5[%c0_9, %c0_10] : memref<1x128xf32, #tpu.memory_space<vmem>>, vector<1x128xf32>
    %12 = vector.broadcast %11 : vector<1x128xf32> to vector<8x128xf32>
    %13 = arith.addf %10, %12 : vector<8x128xf32>
    %cst_11 = arith.constant 0.00999999977 : f32
    %14 = vector.broadcast %cst_11 : f32 to vector<8x128xf32>
    %15 = arith.mulf %14, %13 : vector<8x128xf32>
    %16 = arith.maximumf %13, %15 : vector<8x128xf32>
    %c0_12 = arith.constant 0 : index
    %c0_13 = arith.constant 0 : index
    %17 = vector.load %arg6[%c0_12, %c0_13] : memref<128x128xf32, #tpu.memory_space<vmem>>, vector<128x128xf32>
    %cst_14 = arith.constant dense<0.000000e+00> : vector<8x128xf32>
    %18 = tpu.matmul %16, %17, %cst_14 {dimension_numbers = #tpu.dot_dimension_numbers<[1], [0], [0], [1], [0, 0, 1, 1], [], []>} : vector<8x128xf32>, vector<128x128xf32>, vector<8x128xf32> -> vector<8x128xf32>
    %c0_15 = arith.constant 0 : index
    %c0_16 = arith.constant 0 : index
    %19 = vector.load %arg7[%c0_15, %c0_16] : memref<1x128xf32, #tpu.memory_space<vmem>>, vector<1x128xf32>
    %20 = vector.broadcast %19 : vector<1x128xf32> to vector<8x128xf32>
    %21 = arith.addf %18, %20 : vector<8x128xf32>
    %c0_17 = arith.constant 0 : index
    %c0_18 = arith.constant 0 : index
    %22 = vector.load %arg8[%c0_17, %c0_18] : memref<8x128xf32, #tpu.memory_space<vmem>>, vector<8x128xf32>
    tpu.vector_store %arg8[%c0_17, %c0_18], %21 {strides = array<i32>} : memref<8x128xf32, #tpu.memory_space<vmem>>, vector<8x128xf32>,
    return
  }
  func.func @transform_0(%arg0: i32) -> (i32, i32) {
    %c0_i32 = arith.constant 0 : i32
    %c0_i32_0 = arith.constant 0 : i32
    return %arg0, %c0_i32 : i32, i32
  }
  func.func @transform_1(%arg0: i32) -> (i32, i32) {
    %c0_i32 = arith.constant 0 : i32
    %c0_i32_0 = arith.constant 0 : i32
    %c0_i32_1 = arith.constant 0 : i32
    return %c0_i32, %c0_i32_0 : i32, i32
  }
  func.func @transform_2(%arg0: i32) -> (i32, i32) {
    %c0_i32 = arith.constant 0 : i32
    %c0_i32_0 = arith.constant 0 : i32
    %c0_i32_1 = arith.constant 0 : i32
    return %c0_i32, %c0_i32_0 : i32, i32
  }
  func.func @transform_3(%arg0: i32) -> (i32, i32) {
    %c0_i32 = arith.constant 0 : i32
    %c0_i32_0 = arith.constant 0 : i32
    %c0_i32_1 = arith.constant 0 : i32
    return %c0_i32, %c0_i32_0 : i32, i32
  }
  func.func @transform_4(%arg0: i32) -> (i32, i32) {
    %c0_i32 = arith.constant 0 : i32
    %c0_i32_0 = arith.constant 0 : i32
    %c0_i32_1 = arith.constant 0 : i32
    return %c0_i32, %c0_i32_0 : i32, i32
  }
  func.func @transform_5(%arg0: i32) -> (i32, i32) {
    %c0_i32 = arith.constant 0 : i32
    %c0_i32_0 = arith.constant 0 : i32
    %c0_i32_1 = arith.constant 0 : i32
    return %c0_i32, %c0_i32_0 : i32, i32
  }
  func.func @transform_6(%arg0: i32) -> (i32, i32) {
    %c0_i32 = arith.constant 0 : i32
    %c0_i32_0 = arith.constant 0 : i32
    %c0_i32_1 = arith.constant 0 : i32
    return %c0_i32, %c0_i32_0 : i32, i32
  }
  func.func @transform_7(%arg0: i32) -> (i32, i32) {
    %c0_i32 = arith.constant 0 : i32
    %c0_i32_0 = arith.constant 0 : i32
    return %arg0, %c0_i32 : i32, i32
  }
}

</mosaic_0001>

<bundles_post_ra>
// kernel: shallow_net_forward.1
= control target key start
LH: loop header
LB: loop body
LE: loop exit
PB: predicated region body
PF: predicated region fallthrough
CT: control target
= control target key end

     0   :  { %s914_s24 = smov 0   ;;  %s1125_s0 = inlined_call_operand.vmem [shape: f32[16,128], index: 0, kind: input, shape index: {}]   ;;  %s1126_s1 = inlined_call_operand.vmem [shape: f32[128,128], index: 1, kind: input, shape index: {}]   ;;  %s1127_s2 = inlined_call_operand.vmem [shape: f32[1,128], index: 2, kind: input, shape index: {}]   ;;  %s1128_s3 = inlined_call_operand.vmem [shape: f32[128,128], index: 3, kind: input, shape index: {}]   ;;  %s1129_s4 = inlined_call_operand.vmem [shape: f32[1,128], index: 4, kind: input, shape index: {}]   ;;  %s1130_s5 = inlined_call_operand.vmem [shape: f32[128,128], index: 5, kind: input, shape index: {}]   ;;  %s1131_s6 = inlined_call_operand.vmem [shape: f32[1,128], index: 6, kind: input, shape index: {}]   ;;  %s1132_s7 = inlined_call_operand.vmem [shape: f32[16,128], index: 7, kind: output, shape index: {}]  }
   0x1 LB: > { %s612_s25 = sadd.s32 4294967295, %s869_s24   ;;  %p616_p0 = scmp.ge.s32.totalorder %s869_s24, 1  ;;  %s869_s24 = sphi %s914_s24, %s17_s24  }
   0x2   : > { %p236_p1 = scmp.lt.s32.totalorder %s869_s24, 3 }
   0x4   : > { %p237_p2 = pnand %p616_p0, %p236_p1 }
   0x5   : > { %v275_v0 = vld [vmem:[%s1126_s1] sm:$0xff] (!%p237_p2)  ;;  %v276_v1 = vld [vmem:[%s1126_s1 + $0x8] sm:$0xff] (!%p237_p2)  ;;  %v277_v2 = vld [vmem:[%s1126_s1 + $0x10] sm:$0xff] (!%p237_p2)  ;;  %v871_v3 = vmov (!%p237_p2), 0.0|0.0   ;;  %vm872_vm0 = vmmov (!%p237_p2), 0   ;;  %v873_v6 = vmov (!%p237_p2), 0.0  }
   0x6   : > { %240 = sbr.rel (%p237_p2) target bundleno = 690 (0x2b2), region = 48  ;;  %780 = vmatprep.subr.bf16.mxu0 (!%p237_p2), %v871_v3  ;;  %v781_v4 = vpack.c.bf16 (!%p237_p2), %v276_v1, %v275_v0  ;;  %v278_v5 = vld [vmem:[%s1126_s1 + $0x18] sm:$0xff] (!%p237_p2)  ;;  %707 = vmatprep.mubr.msk.f32.mxu0 (!%p237_p2), %vm872_vm0, %v873_v6  ;;  %v279_v8 = vld [vmem:[%s1126_s1 + $0x20] sm:$0xff] (!%p237_p2)  ;;  %v280_v9 = vld [vmem:[%s1126_s1 + $0x28] sm:$0xff] (!%p237_p2)  ;;  %p266_p3 = scmp.lt.s32.totalorder (!%p237_p2), %s612_s25, 1 }
   0x7   : > { %804 = vmatprep.subr.bf16.mxu1 (!%p237_p2), %v871_v3  ;;  %742 = vmatprep.mubr.msk.f32.mxu1 (!%p237_p2), %vm872_vm0, %v873_v6  ;;  %v784_v7 = vpack.c.bf16 (!%p237_p2), %v278_v5, %v277_v2  ;;  %v370_v10 = vld [vmem:[%s1128_s3] sm:$0xff] (!%p237_p2)  ;;  %v371_v11 = vld [vmem:[%s1128_s3 + $0x8] sm:$0xff] (!%p237_p2)  ;;  %v372_v13 = vld [vmem:[%s1128_s3 + $0x10] sm:$0xff] (!%p237_p2)  ;;  %v787_v15 = vpack.c.bf16 (!%p237_p2), %v280_v9, %v279_v8 }
   0x8   : > { %782 = vmatpush3.bf16.msra.mxu0 (!%p237_p2), %v781_v4  ;;  %v805_v12 = vpack.c.bf16 (!%p237_p2), %v371_v11, %v370_v10  ;;  %v373_v14 = vld [vmem:[%s1128_s3 + $0x18] sm:$0xff] (!%p237_p2)  ;;  %v281_v16 = vld [vmem:[%s1126_s1 + $0x30] sm:$0xff] (!%p237_p2)  ;;  %v374_v19 = vld [vmem:[%s1128_s3 + $0x20] sm:$0xff] (!%p237_p2) }
   0x9   : > { %783 = vmatprep.subr.bf16.mxu0 (!%p237_p2), %v871_v3  ;;  %v282_v17 = vld [vmem:[%s1126_s1 + $0x38] sm:$0xff] (!%p237_p2)  ;;  %v808_v18 = vpack.c.bf16 (!%p237_p2), %v373_v14, %v372_v13  ;;  %v375_v20 = vld [vmem:[%s1128_s3 + $0x28] sm:$0xff] (!%p237_p2)  ;;  %v283_v22 = vld [vmem:[%s1126_s1 + $0x40] sm:$0xff] (!%p237_p2) }
   0xa   : > { %806 = vmatpush3.bf16.msra.mxu1 (!%p237_p2), %v805_v12  ;;  %v790_v21 = vpack.c.bf16 (!%p237_p2), %v282_v17, %v281_v16  ;;  %v284_v23 = vld [vmem:[%s1126_s1 + $0x48] sm:$0xff] (!%p237_p2)  ;;  %v811_v24 = vpack.c.bf16 (!%p237_p2), %v375_v20, %v374_v19  ;;  %v376_v25 = vld [vmem:[%s1128_s3 + $0x30] sm:$0xff] (!%p237_p2)  ;;  %v377_v26 = vld [vmem:[%s1128_s3 + $0x38] sm:$0xff] (!%p237_p2) }
   0xb   : > { %807 = vmatprep.subr.bf16.mxu1 (!%p237_p2), %v871_v3  ;;  %v793_v27 = vpack.c.bf16 (!%p237_p2), %v284_v23, %v283_v22  ;;  %v285_v28 = vld [vmem:[%s1126_s1 + $0x50] sm:$0xff] (!%p237_p2)  ;;  %v286_v29 = vld [vmem:[%s1126_s1 + $0x58] sm:$0xff] (!%p237_p2)  ;;  %v814_v30 = vpack.c.bf16 (!%p237_p2), %v377_v26, %v376_v25  ;;  %v378_v31 = vld [vmem:[%s1128_s3 + $0x40] sm:$0xff] (!%p237_p2) }
   0xc   : > { %785 = vmatpush3.bf16.msra.mxu0 (!%p237_p2), %v784_v7  ;;  %v379_v32 = vld [vmem:[%s1128_s3 + $0x48] sm:$0xff] (!%p237_p2)  ;;  %v796_v33 = vpack.c.bf16 (!%p237_p2), %v286_v29, %v285_v28  ;;  %v287_v34 = vld [vmem:[%s1126_s1 + $0x60] sm:$0xff] (!%p237_p2)  ;;  %v380_v37 = vld [vmem:[%s1128_s3 + $0x50] sm:$0xff] (!%p237_p2) }
   0xd   : > { %786 = vmatprep.subr.bf16.mxu0 %v871_v3  ;;  %v288_v35 = vld [vmem:[%s1126_s1 + $0x68] sm:$0xff]  ;;  %v817_v36 = vpack.c.bf16 %v379_v32, %v378_v31  ;;  %s1134_s25 = smov (!%p266_p3, %s612_s25), 1  ;;  %v381_v38 = vld [vmem:[%s1128_s3 + $0x58] sm:$0xff]  ;;  %v289_v40 = vld [vmem:[%s1126_s1 + $0x70] sm:$0xff] }
   0xe   : > { %809 = vmatpush3.bf16.msra.mxu1 %v808_v18  ;;  %v799_v39 = vpack.c.bf16 %v288_v35, %v287_v34  ;;  %v290_v41 = vld [vmem:[%s1126_s1 + $0x78] sm:$0xff]  ;;  %v820_v42 = vpack.c.bf16 %v381_v38, %v380_v37  ;;  %s617_s17 = sshll.u32 %s1134_s25, 3  ;;  %v382_v45 = vld [vmem:[%s1128_s3 + $0x60] sm:$0xff]  ;;  %v383_v46 = vld [vmem:[%s1128_s3 + $0x68] sm:$0xff] }
   0xf   : > { %810 = vmatprep.subr.bf16.mxu1 %v871_v3  ;;  %v802_v43 = vpack.c.bf16 %v290_v41, %v289_v40  ;;  %s269_s20 = scalar_lea.vmem %s1125_s0, %s617_s17  ;;  %v823_v47 = vpack.c.bf16 %v383_v46, %v382_v45  ;;  %v384_v48 = vld [vmem:[%s1128_s3 + $0x70] sm:$0xff]  ;;  %v385_v49 = vld [vmem:[%s1128_s3 + $0x78] sm:$0xff]  ;;  %v465_v51 = vld [vmem:[%s1130_s5] sm:$0xff]  ;;  %s273_s8 = scalar_lea.vmem %s1132_s7, %s617_s17 }
  0x10   : > { %788 = vmatpush3.bf16.msra.mxu0 %v787_v15  ;;  %v274_v44 = vld [vmem:[%s269_s20] sm:$0xff]  ;;  %v826_v50 = vpack.c.bf16 %v385_v49, %v384_v48  ;;  %v466_v52 = vld [vmem:[%s1130_s5 + $0x8] sm:$0xff]  ;;  %v467_v53 = vld [vmem:[%s1130_s5 + $0x10] sm:$0xff] }
  0x11   : > { %789 = vmatprep.subr.bf16.mxu0 %v871_v3  ;;  %v829_v54 = vpack.c.bf16 %v466_v52, %v465_v51  ;;  %v468_v55 = vld [vmem:[%s1130_s5 + $0x18] sm:$0xff]  ;;  %v469_v57 = vld [vmem:[%s1130_s5 + $0x20] sm:$0xff]  ;;  %v470_v58 = vld [vmem:[%s1130_s5 + $0x28] sm:$0xff] }
  0x12   : > { %812 = vmatpush3.bf16.msra.mxu1 %v811_v24  ;;  %v832_v56 = vpack.c.bf16 %v468_v55, %v467_v53  ;;  %v835_v59 = vpack.c.bf16 %v470_v58, %v469_v57  ;;  %v471_v60 = vld [vmem:[%s1130_s5 + $0x30] sm:$0xff]  ;;  %v472_v61 = vld [vmem:[%s1130_s5 + $0x38] sm:$0xff]  ;;  %v473_v63 = vld [vmem:[%s1130_s5 + $0x40] sm:$0xff] }
  0x13   : > { %813 = vmatprep.subr.bf16.mxu1 %v871_v3  ;;  %v838_v62 = vpack.c.bf16 %v472_v61, %v471_v60  ;;  %v474_v0 = vld [vmem:[%s1130_s5 + $0x48] sm:$0xff]  ;;  %v475_v2 = vld [vmem:[%s1130_s5 + $0x50] sm:$0xff]  ;;  %v476_v4 = vld [vmem:[%s1130_s5 + $0x58] sm:$0xff] }
  0x14   : > { %791 = vmatpush3.bf16.msra.mxu0 %v790_v21  ;;  %v841_v1 = vpack.c.bf16 %v474_v0, %v473_v63  ;;  %v844_v5 = vpack.c.bf16 %v476_v4, %v475_v2  ;;  %v477_v12 = vld [vmem:[%s1130_s5 + $0x60] sm:$0xff]  ;;  %v478_v13 = vld [vmem:[%s1130_s5 + $0x68] sm:$0xff]  ;;  %v479_v15 = vld [vmem:[%s1130_s5 + $0x70] sm:$0xff] }
  0x15   : > { %792 = vmatprep.subr.bf16.mxu0 %v871_v3  ;;  %v847_v14 = vpack.c.bf16 %v478_v13, %v477_v12  ;;  %v480_v16 = vld [vmem:[%s1130_s5 + $0x78] sm:$0xff]  ;;  %v620_v18 = vld [vmem:[%s1129_s4] ss:$0 sm:$0xff] }
  0x16   : > { %815 = vmatpush3.bf16.msra.mxu1 %v814_v30  ;;  %v850_v17 = vpack.c.bf16 %v480_v16, %v479_v15 }
  0x17   : > { %816 = vmatprep.subr.bf16.mxu1 %v871_v3 }
  0x18   : > { %794 = vmatpush3.bf16.msra.mxu0 %v793_v27 }
  0x19   : > { %795 = vmatprep.subr.bf16.mxu0 %v871_v3 }
  0x1a   : > { %818 = vmatpush3.bf16.msra.mxu1 %v817_v36 }
  0x1b   : > { %819 = vmatprep.subr.bf16.mxu1 %v871_v3 }
  0x1c   : > { %797 = vmatpush3.bf16.msra.mxu0 %v796_v33 }
  0x1d   : > { %798 = vmatprep.subr.bf16.mxu0 %v871_v3 }
  0x1e   : > { %821 = vmatpush3.bf16.msra.mxu1 %v820_v42 }
  0x1f   : > { %822 = vmatprep.subr.bf16.mxu1 %v871_v3 }
  0x20   : > { %800 = vmatpush3.bf16.msra.mxu0 %v799_v39 }
  0x21   : > { %801 = vmatprep.subr.bf16.mxu0 %v871_v3 }
  0x22   : > { %824 = vmatpush3.bf16.msra.mxu1 %v823_v47 }
  0x23   : > { %825 = vmatprep.subr.bf16.mxu1 %v871_v3 }
  0x24   : > { %803 = vmatpush3.bf16.msra.mxu0 %v802_v43 }
  0x25   : > { %828 = vmatprep.subr.bf16.mxu0 %v871_v3 }
  0x26   : > { %827 = vmatpush3.bf16.msra.mxu1 %v826_v50 }
  0x27   : > { %708 = vmatmul.mubr.f32.vlgmr.msra.gmra.mrb[0].mxu0 %v274_v44 }
  0x28   : > { %777 = vmatprep.mubr.msk.f32.mxu0 %vm872_vm0, %v873_v6  ;;  %830 = vmatpush3.bf16.msra.mxu0 %v829_v54  ;;  %v619_v6 = vld [vmem:[%s1127_s2] ss:$0 sm:$0xff] }
  0x29   : > { %831 = vmatprep.subr.bf16.mxu0 %v871_v3 }
  0x2c   : > { %833 = vmatpush3.bf16.msra.mxu0 %v832_v56 }
  0x2d   : > { %834 = vmatprep.subr.bf16.mxu0 %v871_v3 }
  0x30   : > { %836 = vmatpush3.bf16.msra.mxu0 %v835_v59 }
  0x31   : > { %837 = vmatprep.subr.bf16.mxu0 %v871_v3 }
  0x34   : > { %839 = vmatpush3.bf16.msra.mxu0 %v838_v62 }
  0x35   : > { %840 = vmatprep.subr.bf16.mxu0 %v871_v3 }
  0x38   : > { %842 = vmatpush3.bf16.msra.mxu0 %v841_v1 }
  0x39   : > { %843 = vmatprep.subr.bf16.mxu0 %v871_v3 }
  0x3c   : > { %845 = vmatpush3.bf16.msra.mxu0 %v844_v5 }
  0x3d   : > { %846 = vmatprep.subr.bf16.mxu0 %v871_v3 }
  0x40   : > { %848 = vmatpush3.bf16.msra.mxu0 %v847_v14 }
  0x41   : > { %849 = vmatprep.subr.bf16.mxu0 %v871_v3  ;;  %v621_v3 = vld [vmem:[%s1131_s6] ss:$0 sm:$0xff] }
  0x44   : > { %851 = vmatpush3.bf16.msra.mxu0 %v850_v17 }
  0xfa   : > { %v364_v7 = vpop.f32.mrb[0].mxu0 }
  0xfb   : > { %v365_v8 = vadd.f32 %v619_v6, %v364_v7  ;;  %v709_v9 = vpop.f32.mrb[1].mxu0 }
  0xfd   : > { %v368_v10 = vmul.f32 0.01, %v365_v8 }
  0xff   : > { %v369_v11 = vmax.f32 %v365_v8, %v368_v10 }
 0x101   : > { %743 = vmatmul.mubr.f32.vlgmr.msra.gmra.mrb[0].mxu1 %v369_v11 }
 0x1d4   : > { %v459_v19 = vpop.f32.mrb[0].mxu1 }
 0x1d5   : > { %v460_v20 = vadd.f32 %v620_v18, %v459_v19  ;;  %v744_v21 = vpop.f32.mrb[1].mxu1 }
 0x1d7   : > { %v463_v22 = vmul.f32 0.01, %v460_v20 }
 0x1d9   : > { %v464_v23 = vmax.f32 %v460_v20, %v463_v22 }
 0x1db   : > { %778 = vmatmul.mubr.f32.vlgmr.msra.gmra.mrb[2].mxu0 %v464_v23 }
 0x2ae   : > { %v554_v24 = vpop.f32.mrb[2].mxu0 }
 0x2af   : > { %v555_v25 = vadd.f32 %v621_v3, %v554_v24  ;;  %v779_v26 = vpop.f32.mrb[3].mxu0 }
 0x2b1   : > { %558 = vst [vmem:[%s273_s8] sm:$0xff] %v555_v25 }
 0x2b2 PF: > { %s17_s24 = sadd.s32 1, %s869_s24  }
 0x2b3   : > { %p14_p4 = scmp.ge.s32.totalorder %s17_s24, 4  }
 0x2b5   :  { %16 = sbr.rel (!%p14_p4) target bundleno = 1 (0x1), region = 78 }

</bundles_post_ra>
